<compile_context>
chip_gen: v5e
topology: v5e:2x2
jax: 0.10.0
libtpu: 0.0.40
codegen_flags: <defaults>
</compile_context>

<pallas_src>
import jax
import jax.numpy as jnp
from jax.experimental import pallas as pl
from jax.experimental.pallas import tpu as pltpu


# --------------------------------------------------------------------------
# Kernel
# --------------------------------------------------------------------------
def _mlp_kernel(x_ref, wg_ref, wu_ref, wd_ref, o_ref, acc_ref):
    # x_ref:   (tm, H)      token tile (constant across the j axis)
    # wg_ref:  (H, ti)      gate_proj weight tile (pre-transposed)
    # wu_ref:  (H, ti)      up_proj weight tile (pre-transposed)
    # wd_ref:  (ti, H)      down_proj weight tile (pre-transposed)
    # o_ref:   (tm, H)      output tile (same block for every j)
    # acc_ref: (tm, H) f32  VMEM accumulator
    j = pl.program_id(1)

    @pl.when(j == 0)
    def _():
        acc_ref[...] = jnp.zeros_like(acc_ref)

    x = x_ref[...]
    gate = jnp.dot(x, wg_ref[...], preferred_element_type=jnp.float32)  # (tm, ti)
    up = jnp.dot(x, wu_ref[...], preferred_element_type=jnp.float32)    # (tm, ti)
    # SiLU in f32 (safe on all generations; v5e VPU/EUP have no bf16).
    act = gate * jax.nn.sigmoid(gate)
    hidden = (act * up).astype(wd_ref.dtype)
    # Partial down-projection, accumulated in f32.
    acc_ref[...] += jnp.dot(hidden, wd_ref[...], preferred_element_type=jnp.float32)

    @pl.when(j == pl.num_programs(1) - 1)
    def _():
        o_ref[...] = acc_ref[...].astype(o_ref.dtype)


# --------------------------------------------------------------------------
# Per-generation defaults
# --------------------------------------------------------------------------
def _default_tiles():
    """(tm, ti, vmem_limit_bytes) derived from the chip's VMEM capacity."""
    vmem_cap = 64 * 1024 * 1024  # conservative fallback (fits every generation)
    try:
        vmem_cap = int(pltpu.get_tpu_info().vmem_capacity_bytes)
    except Exception:
        pass
    if vmem_cap >= 100 * 1024 * 1024:        # v5e / v6e: 128 MiB VMEM
        tm, ti, limit = 768, 1024, 100 * 1024 * 1024
    else:                                    # v7x: 64 MiB VMEM per TensorCore
        tm, ti, limit = 512, 256, 52 * 1024 * 1024
    limit = min(limit, int(vmem_cap * 0.9))
    return tm, ti, limit


def _shrink_to_budget(tm, ti, H, compute_itemsize, out_itemsize, budget, row_align):
    """Shrink ti (intensity scales with tm, not ti) then tm to fit VMEM budget."""
    def est(tm_, ti_):
        in_b = 2 * (tm_ * H + 2 * H * ti_ + ti_ * H) * compute_itemsize  # dbl-buffered inputs
        out_b = 2 * tm_ * H * out_itemsize                               # dbl-buffered output
        acc_b = tm_ * H * 4                                              # f32 accumulator
        return in_b + out_b + acc_b

    while est(tm, ti) > budget and (ti > 256 or tm > 2 * row_align):
        if ti > 256:
            ti //= 2
        else:
            tm = max(row_align, tm // 2)
    return tm, ti


# --------------------------------------------------------------------------
# Weight preparation (call ONCE at weight-load time — not in the hot path)
# --------------------------------------------------------------------------
def prepare_mlp_weights(w_gate, w_up, w_down, *, compute_dtype=jnp.bfloat16):
    """PyTorch-layout [out, in] weights -> matmul-friendly transposed, cast tiles.

    w_gate: [I, H], w_up: [I, H], w_down: [H, I]
    returns (wg_t [H, I], wu_t [H, I], wd_t [I, H]) in compute_dtype.
    """
    cd = compute_dtype
    return (jnp.asarray(w_gate).T.astype(cd),
            jnp.asarray(w_up).T.astype(cd),
            jnp.asarray(w_down).T.astype(cd))


# --------------------------------------------------------------------------
# Forward (hot path: weights already prepared)
# --------------------------------------------------------------------------
def mlp_forward_prepared(x, wg_t, wu_t, wd_t, *, tm=None, ti=None,
                         out_dtype=None, vmem_limit_bytes=None):
    """x: [..., H];  wg_t/wu_t: [H, I];  wd_t: [I, H]  (from prepare_mlp_weights)."""
    orig_shape = x.shape
    H = orig_shape[-1]
    I = wg_t.shape[1]
    assert wg_t.shape == (H, I) and wu_t.shape == (H, I) and wd_t.shape == (I, H)

    compute_dtype = wg_t.dtype
    out_dtype = x.dtype if out_dtype is None else out_dtype
    c_item = jnp.dtype(compute_dtype).itemsize
    o_item = jnp.dtype(out_dtype).itemsize

    x2 = x.reshape(-1, H).astype(compute_dtype)
    M = x2.shape[0]

    # ---- tile defaults (per generation) ---------------------------------
    d_tm, d_ti, d_vmem = _default_tiles()
    vmem_limit = d_vmem if vmem_limit_bytes is None else vmem_limit_bytes
    use_defaults = tm is None and ti is None
    tm = d_tm if tm is None else tm
    ti = d_ti if ti is None else ti

    # Packed sublane height: 8 rows (f32), 16 (bf16), 32 (int8/fp8).
    row_align = 8 * max(1, 4 // c_item)
    if use_defaults:
        tm, ti = _shrink_to_budget(tm, ti, H, c_item, o_item,
                                   int(0.85 * vmem_limit), row_align)

    # ---- token tile / M padding ----------------------------------------
    m_round = pl.cdiv(M, row_align) * row_align
    tm = min(tm, m_round)
    tm = max(row_align, (tm // row_align) * row_align)
    m_pad = pl.cdiv(M, tm) * tm
    if m_pad != M:
        x2 = jnp.pad(x2, ((0, m_pad - M), (0, 0)))

    # ---- intermediate tile / I padding ----------------------------------
    if ti >= I:
        ti = I
    else:
        ti = max(128, (ti // 128) * 128)  # lane-aligned when tiling I
        if ti >= I:
            ti = I
    i_pad = pl.cdiv(I, ti) * ti
    nj = i_pad // ti
    if i_pad != I:
        # Zero padding is exact: silu(0) * 0 == 0 and zero rows of wd add 0.
        # (For the true hot path pick ti dividing I, or pre-pad at load time.)
        wg_t = jnp.pad(wg_t, ((0, 0), (0, i_pad - I)))
        wu_t = jnp.pad(wu_t, ((0, 0), (0, i_pad - I)))
        wd_t = jnp.pad(wd_t, ((0, i_pad - I), (0, 0)))

    grid = (m_pad // tm, nj)

    # Serpentine the weight axis: at the i-boundary the last-j tiles stay
    # resident, saving one full weight-tile DMA per M tile.
    def _wj(i, j):
        return jnp.where(i % 2 == 0, j, nj - 1 - j)

    cost = pl.CostEstimate(
        flops=6 * m_pad * H * i_pad,        # 2*M*H*I (gate) + 2*M*H*I (up) + 2*M*I*H (down)
        transcendentals=m_pad * i_pad,      # sigmoid
        bytes_accessed=(
            m_pad * H * c_item
            + (2 * H * i_pad + i_pad * H) * c_item * grid[0]  # weights re-streamed per M tile
            + m_pad * H * o_item
        ),
    )

    out_padded = pl.pallas_call(
        _mlp_kernel,
        out_shape=jax.ShapeDtypeStruct((m_pad, H), out_dtype),
        grid_spec=pltpu.PrefetchScalarGridSpec(
            num_scalar_prefetch=0,
            grid=grid,
            in_specs=[
                pl.BlockSpec((tm, H), lambda i, j: (i, 0)),       # x tile
                pl.BlockSpec((H, ti), lambda i, j: (0, _wj(i, j))),  # gate tile
                pl.BlockSpec((H, ti), lambda i, j: (0, _wj(i, j))),  # up tile
                pl.BlockSpec((ti, H), lambda i, j: (_wj(i, j), 0)),  # down tile
            ],
            out_specs=pl.BlockSpec((tm, H), lambda i, j: (i, 0)),
            scratch_shapes=[pltpu.VMEM((tm, H), jnp.float32)],
        ),
        compiler_params=pltpu.CompilerParams(
            dimension_semantics=("parallel", "arbitrary"),
            vmem_limit_bytes=int(vmem_limit),
        ),
        cost_estimate=cost,
    )(x2, wg_t, wu_t, wd_t)

    return out_padded[:M].reshape(orig_shape)


# --------------------------------------------------------------------------
# Convenience wrapper: PyTorch-layout weights, per-call prep (use the
# prepared path above for inference / training hot loops).
# --------------------------------------------------------------------------
def mlp_forward(x, w_gate, w_up, w_down, *, compute_dtype="auto",
                tm=None, ti=None, vmem_limit_bytes=None):
    """x: [B, S, H]; w_gate/w_up: [I, H]; w_down: [H, I] (PyTorch Linear layout)."""
    if compute_dtype is None or (isinstance(compute_dtype, str) and compute_dtype == "auto"):
        # bf16 by default: MXU is bf16-native on v5e/v6e/v7x and it halves DMA bytes;
        # accumulation stays f32 in the kernel.
        compute_dtype = jnp.bfloat16 if x.dtype == jnp.float32 else x.dtype
    wg_t, wu_t, wd_t = prepare_mlp_weights(w_gate, w_up, w_down,
                                           compute_dtype=compute_dtype)
    return mlp_forward_prepared(x, wg_t, wu_t, wd_t, tm=tm, ti=ti,
                                out_dtype=x.dtype,
                                vmem_limit_bytes=vmem_limit_bytes)


# --------------------------------------------------------------------------
# Self-test
# --------------------------------------------------------------------------
if __name__ == "__main__":
    def ref_mlp(x, wg, wu, wd):
        g = x @ wg.T
        u = x @ wu.T
        return (g * jax.nn.sigmoid(g) * u) @ wd.T

    key = jax.random.PRNGKey(0)
    ks = jax.random.split(key, 8)

    # --- Test 1: module-scale small shapes, explicit f32 compute (exact) ---
    B, S, H, I = 2, 8, 32, 64
    x = jax.random.normal(ks[0], (B, S, H), dtype=jnp.float32)
    w_gate = jax.random.normal(ks[1], (I, H), dtype=jnp.float32) * 0.05
    w_up = jax.random.normal(ks[2], (I, H), dtype=jnp.float32) * 0.05
    w_down = jax.random.normal(ks[3], (H, I), dtype=jnp.float32) * 0.05

    out = jax.block_until_ready(
        mlp_forward(x, w_gate, w_up, w_down, compute_dtype=jnp.float32))
    ref = ref_mlp(x, w_gate, w_up, w_down)
    assert out.shape == (B, S, H)
    assert jnp.allclose(out, ref, atol=1e-3, rtol=1e-3), \
        float(jnp.max(jnp.abs(out - ref)))

    # --- Test 2: ragged M + multi-tile I (serpentine), default bf16 path ---
    B2, S2, H2, I2 = 2, 72, 128, 384   # M=144 (ragged vs tm=64), I in 3 tiles
    x2 = jax.random.normal(ks[4], (B2, S2, H2), dtype=jnp.float32)
    wg2 = jax.random.normal(ks[5], (I2, H2), dtype=jnp.float32) * 0.05
    wu2 = jax.random.normal(ks[6], (I2, H2), dtype=jnp.float32) * 0.05
    wd2 = jax.random.normal(ks[7], (H2, I2), dtype=jnp.float32) * 0.05

    ref2 = ref_mlp(x2, wg2, wu2, wd2)
    out2 = jax.block_until_ready(mlp_forward(x2, wg2, wu2, wd2, tm=64, ti=128))
    assert out2.shape == (B2, S2, H2)
    assert jnp.allclose(out2, ref2, atol=5e-2, rtol=5e-2)

    # --- Test 3: prepared-weights hot path + I padding (ti=256 vs I=384) ---
    wgt, wut, wdt = prepare_mlp_weights(wg2, wu2, wd2, compute_dtype=jnp.bfloat16)
    out3 = jax.block_until_ready(
        mlp_forward_prepared(x2, wgt, wut, wdt, tm=64, ti=256, out_dtype=x2.dtype))
    assert out3.shape == (B2, S2, H2)
    assert jnp.allclose(out3, ref2, atol=5e-2, rtol=5e-2)

    print("KERNEL_OK")
</pallas_src>

<mosaic_0001>
module attributes {stable_mosaic.version = 11 : i64} {
  func.func @_mlp_kernel(%arg0: i32, %arg1: i32, %arg2: memref<16x32xf32, #tpu.memory_space<vmem>>, %arg3: memref<32x64xf32, #tpu.memory_space<vmem>>, %arg4: memref<32x64xf32, #tpu.memory_space<vmem>>, %arg5: memref<64x32xf32, #tpu.memory_space<vmem>>, %arg6: memref<16x32xf32, #tpu.memory_space<vmem>>, %arg7: memref<16x32xf32, #tpu.memory_space<vmem>>) attributes {dimension_semantics = [#tpu.dimension_semantics<parallel>, #tpu.dimension_semantics<arbitrary>], iteration_bounds = array<i64: 1, 1>, scalar_prefetch = 0 : i64, scratch_operands = 1 : i64, tpu.core_type = #tpu.core_type<tc>, window_params = [{transform_indices = @transform_0, window_bounds = array<i64: 16, 32>}, {transform_indices = @transform_1, window_bounds = array<i64: 32, 64>}, {transform_indices = @transform_2, window_bounds = array<i64: 32, 64>}, {transform_indices = @transform_3, window_bounds = array<i64: 64, 32>}, {transform_indices = @transform_4, window_bounds = array<i64: 16, 32>}]} {
    %c0_i32 = arith.constant 0 : i32
    %0 = arith.cmpi eq, %arg1, %c0_i32 : i32
    %1 = arith.extui %0 : i1 to i32
    %c0_i32_0 = arith.constant 0 : i32
    %2 = arith.cmpi ne, %1, %c0_i32_0 : i32
    scf.if %2 {
      %cst_17 = arith.constant 0.000000e+00 : f32
      %23 = vector.broadcast %cst_17 : f32 to vector<16x32xf32>
      %c0_18 = arith.constant 0 : index
      %c0_19 = arith.constant 0 : index
      %24 = vector.load %arg7[%c0_18, %c0_19] : memref<16x32xf32, #tpu.memory_space<vmem>>, vector<16x32xf32>
      tpu.vector_store %arg7[%c0_18, %c0_19], %23 {strides = array<i32>} : memref<16x32xf32, #tpu.memory_space<vmem>>, vector<16x32xf32>,
    } else {
    }
    %c0 = arith.constant 0 : index
    %c0_1 = arith.constant 0 : index
    %3 = vector.load %arg2[%c0, %c0_1] : memref<16x32xf32, #tpu.memory_space<vmem>>, vector<16x32xf32>
    %c0_2 = arith.constant 0 : index
    %c0_3 = arith.constant 0 : index
    %4 = vector.load %arg3[%c0_2, %c0_3] : memref<32x64xf32, #tpu.memory_space<vmem>>, vector<32x64xf32>
    %cst = arith.constant dense<0.000000e+00> : vector<16x64xf32>
    %5 = tpu.matmul %3, %4, %cst {dimension_numbers = #tpu.dot_dimension_numbers<[1], [0], [0], [1], [0, 0, 1, 1], [], []>} : vector<16x32xf32>, vector<32x64xf32>, vector<16x64xf32> -> vector<16x64xf32>
    %c0_4 = arith.constant 0 : index
    %c0_5 = arith.constant 0 : index
    %6 = vector.load %arg4[%c0_4, %c0_5] : memref<32x64xf32, #tpu.memory_space<vmem>>, vector<32x64xf32>
    %cst_6 = arith.constant dense<0.000000e+00> : vector<16x64xf32>
    %7 = tpu.matmul %3, %6, %cst_6 {dimension_numbers = #tpu.dot_dimension_numbers<[1], [0], [0], [1], [0, 0, 1, 1], [], []>} : vector<16x32xf32>, vector<32x64xf32>, vector<16x64xf32> -> vector<16x64xf32>
    %8 = arith.negf %5 : vector<16x64xf32>
    %9 = math.exp %8 : vector<16x64xf32>
    %cst_7 = arith.constant 1.000000e+00 : f32
    %10 = vector.broadcast %cst_7 : f32 to vector<16x64xf32>
    %11 = arith.addf %10, %9 : vector<16x64xf32>
    %12 = arith.divf %10, %11 : vector<16x64xf32>
    %13 = arith.mulf %5, %12 : vector<16x64xf32>
    %14 = arith.mulf %13, %7 : vector<16x64xf32>
    %c0_8 = arith.constant 0 : index
    %c0_9 = arith.constant 0 : index
    %15 = vector.load %arg7[%c0_8, %c0_9] : memref<16x32xf32, #tpu.memory_space<vmem>>, vector<16x32xf32>
    %c0_10 = arith.constant 0 : index
    %c0_11 = arith.constant 0 : index
    %16 = vector.load %arg5[%c0_10, %c0_11] : memref<64x32xf32, #tpu.memory_space<vmem>>, vector<64x32xf32>
    %cst_12 = arith.constant dense<0.000000e+00> : vector<16x32xf32>
    %17 = tpu.matmul %14, %16, %cst_12 {dimension_numbers = #tpu.dot_dimension_numbers<[1], [0], [0], [1], [0, 0, 1, 1], [], []>} : vector<16x64xf32>, vector<64x32xf32>, vector<16x32xf32> -> vector<16x32xf32>
    %18 = arith.addf %15, %17 : vector<16x32xf32>
    %c0_13 = arith.constant 0 : index
    %c0_14 = arith.constant 0 : index
    %19 = vector.load %arg7[%c0_13, %c0_14] : memref<16x32xf32, #tpu.memory_space<vmem>>, vector<16x32xf32>
    tpu.vector_store %arg7[%c0_13, %c0_14], %18 {strides = array<i32>} : memref<16x32xf32, #tpu.memory_space<vmem>>, vector<16x32xf32>,
    %c0_i32_15 = arith.constant 0 : i32
    %20 = arith.cmpi eq, %arg1, %c0_i32_15 : i32
    %21 = arith.extui %20 : i1 to i32
    %c0_i32_16 = arith.constant 0 : i32
    %22 = arith.cmpi ne, %21, %c0_i32_16 : i32
    scf.if %22 {
      %c0_17 = arith.constant 0 : index
      %c0_18 = arith.constant 0 : index
      %23 = vector.load %arg7[%c0_17, %c0_18] : memref<16x32xf32, #tpu.memory_space<vmem>>, vector<16x32xf32>
      %c0_19 = arith.constant 0 : index
      %c0_20 = arith.constant 0 : index
      %24 = vector.load %arg6[%c0_19, %c0_20] : memref<16x32xf32, #tpu.memory_space<vmem>>, vector<16x32xf32>
      tpu.vector_store %arg6[%c0_19, %c0_20], %23 {strides = array<i32>} : memref<16x32xf32, #tpu.memory_space<vmem>>, vector<16x32xf32>,
    } else {
    }
    return
  }
  func.func @transform_0(%arg0: i32, %arg1: i32) -> (i32, i32) {
    %c0_i32 = arith.constant 0 : i32
    %c0_i32_0 = arith.constant 0 : i32
    return %arg0, %c0_i32 : i32, i32
  }
  func.func @transform_1(%arg0: i32, %arg1: i32) -> (i32, i32) {
    %c2_i32 = arith.constant 2 : i32
    %c0_i32 = arith.constant 0 : i32
    %0 = arith.cmpi eq, %c2_i32, %c0_i32 : i32
    %c1_i32 = arith.constant 1 : i32
    %1 = arith.select %0, %c1_i32, %c2_i32 : i32
    %2 = arith.remsi %arg0, %1 : i32
    %c0_i32_0 = arith.constant 0 : i32
    %3 = arith.cmpi ne, %2, %c0_i32_0 : i32
    %c0_i32_1 = arith.constant 0 : i32
    %4 = arith.cmpi slt, %2, %c0_i32_1 : i32
    %c0_i32_2 = arith.constant 0 : i32
    %5 = arith.cmpi slt, %1, %c0_i32_2 : i32
    %6 = arith.xori %4, %5 : i1
    %7 = arith.andi %6, %3 : i1
    %8 = arith.addi %2, %1 : i32
    %9 = arith.select %7, %8, %2 : i32
    %c0_i32_3 = arith.constant 0 : i32
    %10 = arith.cmpi eq, %9, %c0_i32_3 : i32
    %c0_i32_4 = arith.constant 0 : i32
    %11 = arith.subi %c0_i32_4, %arg1 : i32
    %12 = arith.select %10, %arg1, %11 : i32
    %c0_i32_5 = arith.constant 0 : i32
    %c0_i32_6 = arith.constant 0 : i32
    return %c0_i32_5, %12 : i32, i32
  }
  func.func @transform_2(%arg0: i32, %arg1: i32) -> (i32, i32) {
    %c2_i32 = arith.constant 2 : i32
    %c0_i32 = arith.constant 0 : i32
    %0 = arith.cmpi eq, %c2_i32, %c0_i32 : i32
    %c1_i32 = arith.constant 1 : i32
    %1 = arith.select %0, %c1_i32, %c2_i32 : i32
    %2 = arith.remsi %arg0, %1 : i32
    %c0_i32_0 = arith.constant 0 : i32
    %3 = arith.cmpi ne, %2, %c0_i32_0 : i32
    %c0_i32_1 = arith.constant 0 : i32
    %4 = arith.cmpi slt, %2, %c0_i32_1 : i32
    %c0_i32_2 = arith.constant 0 : i32
    %5 = arith.cmpi slt, %1, %c0_i32_2 : i32
    %6 = arith.xori %4, %5 : i1
    %7 = arith.andi %6, %3 : i1
    %8 = arith.addi %2, %1 : i32
    %9 = arith.select %7, %8, %2 : i32
    %c0_i32_3 = arith.constant 0 : i32
    %10 = arith.cmpi eq, %9, %c0_i32_3 : i32
    %c0_i32_4 = arith.constant 0 : i32
    %11 = arith.subi %c0_i32_4, %arg1 : i32
    %12 = arith.select %10, %arg1, %11 : i32
    %c0_i32_5 = arith.constant 0 : i32
    %c0_i32_6 = arith.constant 0 : i32
    return %c0_i32_5, %12 : i32, i32
  }
  func.func @transform_3(%arg0: i32, %arg1: i32) -> (i32, i32) {
    %c2_i32 = arith.constant 2 : i32
    %c0_i32 = arith.constant 0 : i32
    %0 = arith.cmpi eq, %c2_i32, %c0_i32 : i32
    %c1_i32 = arith.constant 1 : i32
    %1 = arith.select %0, %c1_i32, %c2_i32 : i32
    %2 = arith.remsi %arg0, %1 : i32
    %c0_i32_0 = arith.constant 0 : i32
    %3 = arith.cmpi ne, %2, %c0_i32_0 : i32
    %c0_i32_1 = arith.constant 0 : i32
    %4 = arith.cmpi slt, %2, %c0_i32_1 : i32
    %c0_i32_2 = arith.constant 0 : i32
    %5 = arith.cmpi slt, %1, %c0_i32_2 : i32
    %6 = arith.xori %4, %5 : i1
    %7 = arith.andi %6, %3 : i1
    %8 = arith.addi %2, %1 : i32
    %9 = arith.select %7, %8, %2 : i32
    %c0_i32_3 = arith.constant 0 : i32
    %10 = arith.cmpi eq, %9, %c0_i32_3 : i32
    %c0_i32_4 = arith.constant 0 : i32
    %11 = arith.subi %c0_i32_4, %arg1 : i32
    %12 = arith.select %10, %arg1, %11 : i32
    %c0_i32_5 = arith.constant 0 : i32
    %c0_i32_6 = arith.constant 0 : i32
    return %12, %c0_i32_5 : i32, i32
  }
  func.func @transform_4(%arg0: i32, %arg1: i32) -> (i32, i32) {
    %c0_i32 = arith.constant 0 : i32
    %c0_i32_0 = arith.constant 0 : i32
    return %arg0, %c0_i32 : i32, i32
  }
}

</mosaic_0001>

<bundles_post_ra>
// kernel: tpu_custom_call.1
= control target key start
LH: loop header
LB: loop body
LE: loop exit
PB: predicated region body
PF: predicated region fallthrough
CT: control target
= control target key end

     0   :  { %s575_s0 = inlined_call_operand.vmem [shape: f32[16,32], index: 0, kind: input, shape index: {}]   ;;  %s576_s1 = inlined_call_operand.vmem [shape: f32[32,64], index: 1, kind: input, shape index: {}]   ;;  %s577_s2 = inlined_call_operand.vmem [shape: f32[32,64], index: 2, kind: input, shape index: {}]   ;;  %s578_s3 = inlined_call_operand.vmem [shape: f32[64,32], index: 3, kind: input, shape index: {}]   ;;  %s579_s4 = inlined_call_operand.hbm [shape: f32[16,32], index: 4, kind: output, shape index: {}]  }
   0x1   :  { %v236_v0 = vld [vmem:[%s576_s1 + $0x18] sm:$0xff]  ;;  %v235_v1 = vld [vmem:[%s576_s1 + $0x10] sm:$0xff]  ;;  %v234_v2 = vld [vmem:[%s576_s1 + $0x8] sm:$0xff] }
   0x2   :  { %256 = vmatpush.msra.mxu0 %v236_v0  ;;  %v270_v3 = vld [vmem:[%s577_s2 + $0x18] sm:$0xff]  ;;  %v269_v4 = vld [vmem:[%s577_s2 + $0x10] sm:$0xff] }
   0x3   :  { %283 = vmatpush.msra.mxu1 %v270_v3 }
   0x4   :  { %257 = vmatpush.msra.mxu0 %v235_v1 }
   0x5   :  { %9 = vsyncpa [#allocation4], 0  ;;  %v233_v5 = vld [vmem:[%s576_s1] sm:$0xff]  ;;  %v268_v6 = vld [vmem:[%s577_s2 + $0x8] sm:$0xff]  ;;  %vm228_vm0 = vcmask 261120   ;;  %284 = vmatpush.msra.mxu1 %v269_v4  ;;  %v477_v24 = vmov 0.0  }
   0x6   :  { %258 = vmatpush.msra.mxu0 %v234_v2  ;;  %v231_v7 = vld [vmem:[%s575_s0] sm:$0xff]  ;;  %v232_v9 = vld [vmem:[%s575_s0 + $0x8] sm:$0xff]  ;;  %v345_v10 = vld [vmem:[%s578_s3 + $0x38] sm:$0xff]  ;;  %229 = vst.msk [vmem:[#allocation2] sm:$0xff] %vm228_vm0, %v477_v24  ;;  %vm346_vm5 = vcmask 523264   ;;  %s393_s25 = sshll.u32 %s579_s4, 4  ;;  %s394_s25 = int_to_ptr.hbm [resolvable:$true] %s393_s25 }
   0x7   :  { %v267_v8 = vld [vmem:[%s577_s2] sm:$0xff]  ;;  %285 = vmatpush.msra.mxu1 %v268_v6  ;;  %361 = vmatpush.msra.mxu2 %v345_v10  ;;  %v344_v11 = vld [vmem:[%s578_s3 + $0x30] sm:$0xff]  ;;  %v343_v12 = vld [vmem:[%s578_s3 + $0x28] sm:$0xff]  ;;  %230 = vst.msk [vmem:[#allocation2 + $0x8] sm:$0xff] %vm228_vm0, %v477_v24  ;;  %s479_s26 = smov 128   ;;  %s480_s27 = smov 8  }
   0x8   :  { %259 = vmatpush.msra.mxu0 %v233_v5  ;;  %431 = vmatpush.msra.mxu3 %v345_v10  ;;  %v342_v13 = vld [vmem:[%s578_s3 + $0x20] sm:$0xff]  ;;  %v341_v14 = vld [vmem:[%s578_s3 + $0x18] sm:$0xff]  ;;  %v340_v15 = vld [vmem:[%s578_s3 + $0x10] sm:$0xff] }
   0x9   :  { %423 = vmatmul.msk.f32.vlgmr.msra.gmra.mxu0 %vm228_vm0, %v231_v7  ;;  %286 = vmatpush.msra.mxu1 %v267_v8  ;;  %v339_v16 = vld [vmem:[%s578_s3 + $0x8] sm:$0xff]  ;;  %v338_v17 = vld [vmem:[%s578_s3] sm:$0xff]  ;;  %s478_s3 = smov [#allocation3]  }
   0xa   :  { %425 = vmatmul.msk.f32.vlgmr.msra.gmra.mxu1 %vm228_vm0, %v231_v7  ;;  %362 = vmatpush.msra.mxu2 %v344_v11  ;;  %s391_s22 = sshll.u32 %s478_s3, 4  ;;  %s392_s22 = int_to_ptr.vmem [resolvable:$true] %s391_s22 }
   0xb   :  { %432 = vmatpush.msra.mxu3 %v344_v11 }
   0xc   :  { %363 = vmatpush.msra.mxu2 %v343_v12 }
   0xd   :  { %433 = vmatpush.msra.mxu3 %v343_v12  ;;  %v336_v53 = vld [vmem:[#allocation2] sm:$0xff] }
   0xe   :  { %364 = vmatpush.msra.mxu2 %v342_v13  ;;  %v337_v56 = vld [vmem:[#allocation2 + $0x8] sm:$0xff] }
   0xf   :  { %434 = vmatpush.msra.mxu3 %v342_v13 }
  0x10   :  { %365 = vmatpush.msra.mxu2 %v341_v14 }
  0x11   :  { %424 = vmatmul.msk.f32.gmra.mxu0 %vm228_vm0, %v232_v9  ;;  %435 = vmatpush.msra.mxu3 %v341_v14 }
  0x12   :  { %426 = vmatmul.msk.f32.gmra.mxu1 %vm228_vm0, %v232_v9  ;;  %366 = vmatpush.msra.mxu2 %v340_v15 }
  0x13   :  { %436 = vmatpush.msra.mxu3 %v340_v15 }
  0x14   :  { %367 = vmatpush.msra.mxu2 %v339_v16 }
  0x15   :  { %437 = vmatpush.msra.mxu3 %v339_v16 }
  0x16   :  { %368 = vmatpush.msra.mxu2 %v338_v17 }
  0x17   :  { %438 = vmatpush.msra.mxu3 %v338_v17 }
  0x86   :  { %v261_v18 = vpop.f32.mrf.mxu0 }
  0x87   :  { %v427_v19 = vmul.f32 -1.442695, %v261_v18  ;;  %v288_v36 = vpop.f32.mrf.mxu1 }
  0x89   :  { %443 = vpow2.f32 %v427_v19 }
  0x8e   :  { %v264_v20 = vpop.f32.mrf.mxu0 }
  0x8f   :  { %v444_v21 = vpop.eup %443  ;;  %v428_v22 = vmul.f32 -1.442695, %v264_v20  ;;  %v291_v50 = vpop.f32.mrf.mxu1 }
  0x90   :  { %v300_v23 = vadd.f32 1.0, %v444_v21 }
  0x91   :  { %445 = vpow2.f32 %v428_v22 }
  0x92   :  { %447 = vrcp.f32 %v300_v23  ;;  %v313_v30 = vand.u32 2147483648, %v300_v23  ;;  %v311_v32 = vand.u32 2147483647, %v300_v23  ;;  %vm307_vm2 = vweird.f32 %v300_v23 }
  0x94   :  { %v314_v35 = vor.u32 1.1754944e-38, %v313_v30  ;;  %vm312_vm4 = vcmp.eq.f32.partialorder %v311_v32, 8.507059e+37 }
  0x97   :  { %v446_v25 = vpop.eup %445 }
  0x98   :  { %v448_v26 = vpop.eup %447  ;;  %v301_v27 = vadd.f32 1.0, %v446_v25 }
  0x99   :  { %v303_v28 = vmul.f32 %v448_v26, %v300_v23  ;;  %vm308_vm1 = vweird.f32 %v448_v26 }
  0x9a   :  { %449 = vrcp.f32 %v301_v27  ;;  %vm309_vm3 = vmor %vm307_vm2, %vm308_vm1  ;;  %v328_v42 = vand.u32 2147483648, %v301_v27  ;;  %v326_v44 = vand.u32 2147483647, %v301_v27  ;;  %vm322_vm7 = vweird.f32 %v301_v27 }
  0x9b   :  { %v304_v29 = vsub.f32 1.0, %v303_v28 }
  0x9c   :  { %v329_v47 = vor.u32 1.1754944e-38, %v328_v42  ;;  %vm327_vm9 = vcmp.eq.f32.partialorder %v326_v44, 8.507059e+37 }
  0x9d   :  { %v305_v31 = vmul.f32 %v448_v26, %v304_v29 }
  0x9f   :  { %v306_v33 = vadd.f32 %v448_v26, %v305_v31 }
  0xa0   :  { %v450_v34 = vpop.eup %449 }
  0xa1   :  { %v310_v37 = vsel %vm309_vm3, %v448_v26, %v306_v33  ;;  %v318_v38 = vmul.f32 %v450_v34, %v301_v27  ;;  %vm323_vm6 = vweird.f32 %v450_v34 }
  0xa2   :  { %v315_v39 = vsel %vm312_vm4, %v314_v35, %v310_v37  ;;  %vm324_vm8 = vmor %vm322_vm7, %vm323_vm6 }
  0xa3   :  { %v332_v40 = vmul.f32 %v315_v39, %v261_v18  ;;  %v319_v41 = vsub.f32 1.0, %v318_v38 }
  0xa5   :  { %v320_v43 = vmul.f32 %v450_v34, %v319_v41  ;;  %v334_v45 = vmul.f32 %v332_v40, %v288_v36 }
  0xa7   :  { %v321_v46 = vadd.f32 %v450_v34, %v320_v43  ;;  %429 = vmatmul.msk.f32.vlgmr.msra.gmra.mxu2 %vm346_vm5, %v334_v45 }
  0xa9   :  { %v325_v48 = vsel %vm324_vm8, %v450_v34, %v321_v46 }
  0xaa   :  { %v330_v49 = vsel %vm327_vm9, %v329_v47, %v325_v48 }
  0xab   :  { %v333_v51 = vmul.f32 %v330_v49, %v264_v20 }
  0xad   :  { %v335_v52 = vmul.f32 %v333_v51, %v291_v50 }
  0xaf   :  { %430 = vmatmul.msk.f32.vlgmr.msra.gmra.mxu3 %vm346_vm5, %v335_v52 }
 0x12a   :  { %v370_v54 = vpop.f32.mrf.mxu2 }
 0x12b   :  { %v376_v55 = vadd.f32 %v370_v54, %v336_v53 }
 0x12d   :  { %378 = vst.msk [vmem:[#allocation2] sm:$0xff] %vm228_vm0, %v376_v55 }
 0x132   :  { %v373_v57 = vpop.f32.mrf.mxu3 }
 0x133   :  { %v377_v58 = vadd.f32 %v373_v57, %v337_v56 }
 0x134   :  { %v383_v59 = vld [vmem:[#allocation2] sm:$0xff] }
 0x135   :  { %379 = vst.msk [vmem:[#allocation2 + $0x8] sm:$0xff] %vm228_vm0, %v377_v58 }
 0x136   :  { %385 = vst.msk [vmem:[#allocation3] sm:$0xff] %vm228_vm0, %v383_v59 }
 0x13c   :  { %v384_v60 = vld [vmem:[#allocation2 + $0x8] sm:$0xff] }
 0x13d   :  { %386 = vst.msk [vmem:[#allocation3 + $0x8] sm:$0xff] %vm228_vm0, %v384_v60 }
 0x13e   :  { %399 = dma.vmem_to_hbm [thread:$0]  %s392_s22, 256, %s394_s25, [#allocation4], %s479_s26, %s479_s26, %s480_s27  }
 0x13f   :  { %475 = dma.done.wait [#allocation4], 256  }
 0x140   :  { %476 = vsyncadd [#allocation4], 4294967040 }
 0x141   :  { %404 = vsyncpa [#allocation4], 1 }

</bundles_post_ra>
